<compile_context>
chip_gen: v7x
topology: tpu7x:2x2x1
jax: 0.10.0
libtpu: 0.0.40
codegen_flags: <defaults>
</compile_context>

<pallas_src>
import jax
import jax.numpy as jnp
from jax.experimental import pallas as pl
from jax.experimental.pallas import tpu as pltpu

LANES = 128          # vreg lane width: last dim of the lane-dense view
BLOCK_ROWS = 2048    # (2048, 128) f32 = 1 MiB per block
MIN_PALLAS_N = 32768 # below this, fused XLA elementwise is strictly faster


def _one_neuron_kernel(x_ref, w_ref, b_ref, o_ref):
    # x_ref: (block_rows, 128) VMEM tile.
    # w_ref, b_ref: (1,) scalars in SMEM.
    # Scalar * vector + scalar on the VPU; no broadcast materialization, no MXU.
    o_ref[...] = x_ref[...] * w_ref[0] + b_ref[0]


def one_neuron_linear(x, w, b, *, block_rows=BLOCK_ROWS, min_pallas_n=MIN_PALLAS_N):
    """PyTorch nn.Linear(1, 1) forward: y = x @ W^T + b.

    x: (N, 1), w: (1, 1), b: (1,)  ->  (N, 1), all in x.dtype.
    """
    n = x.shape[0]
    w_s = w.reshape(1).astype(x.dtype)
    b_s = b.reshape(1).astype(x.dtype)

    # Small/medium batches: launch + layout plumbing dominates 8*N bytes of HBM
    # traffic -> let XLA fuse the multiply-add.
    if n < min_pallas_n:
        return x * w_s[0] + b_s[0]

    # Lane-dense view: (N, 1) -> (rows, 128).
    rows = -(-n // LANES)
    padded = rows * LANES != n

    # Block rows: as big as possible (1 MiB blocks) but always >= 2 grid steps
    # so v7x can megacore-shard the batch axis and DMA stays double-buffered.
    half_rows = (((rows + 1) // 2) + 7) // 8 * 8   # multiple of 8 sublanes
    block_rows = max(8, min(block_rows, half_rows))
    grid = (pl.cdiv(rows, block_rows),)            # ragged last block is masked

    x_flat = x.reshape(-1)
    if padded:
        # Pad only to the next 128 multiple (at most 127 elements).  Padded
        # lanes compute w*0 + b and are sliced off below.
        x_flat = jnp.pad(x_flat, (0, rows * LANES - n))
    x2 = x_flat.reshape(rows, LANES)

    y2 = pl.pallas_call(
        _one_neuron_kernel,
        out_shape=jax.ShapeDtypeStruct((rows, LANES), x.dtype),
        grid=grid,
        in_specs=[
            pl.BlockSpec((block_rows, LANES), lambda i: (i, 0)),
            # Scalars live in SMEM: no padded VMEM tiles / double buffers.
            pl.BlockSpec(memory_space=pltpu.MemorySpace.SMEM),
            pl.BlockSpec(memory_space=pltpu.MemorySpace.SMEM),
        ],
        out_specs=pl.BlockSpec((block_rows, LANES), lambda i: (i, 0)),
        compiler_params=pltpu.CompilerParams(
            # Batch axis is embarrassingly parallel -> megacore sharding on v7x.
            # TODO(synk): verify in the profile that "parallel" splits across
            # both v7x TensorCores; switch to pltpu.CORE_PARALLEL if not.
            dimension_semantics=("parallel",),
        ),
    )(x2, w_s, b_s)

    # No pad => no slice; reshape back to (N, 1) is a layout no-op under jit.
    y_flat = y2.reshape(-1)
    if padded:
        y_flat = y_flat[:n]
    return y_flat.reshape(n, 1)


if __name__ == "__main__":
    key = jax.random.PRNGKey(0)
    kx, kw, kb = jax.random.split(key, 3)

    # Deterministic parameters matching nn.Linear(1, 1) shapes.
    w = jax.random.uniform(kw, (1, 1), jnp.float32, minval=-1.0, maxval=1.0)
    b = jax.random.uniform(kb, (1,), jnp.float32, minval=-1.0, maxval=1.0)

    fwd = jax.jit(one_neuron_linear)

    # Exercise: multi-step gridded kernel path (lane-aligned), ragged (padded)
    # kernel path, and the small-batch XLA fallback.
    for n in (262144, 262144 + 1000, 1000, 8):
        x = jax.random.normal(jax.random.fold_in(kx, n), (n, 1), jnp.float32)
        y = jax.block_until_ready(fwd(x, w, b))
        y_ref = x @ w.T + b
        assert y.shape == (n, 1)
        assert jnp.allclose(y, y_ref, atol=1e-6), (
            n, float(jnp.max(jnp.abs(y - y_ref))))

    print("KERNEL_OK")
</pallas_src>

<mosaic_0001>
module attributes {stable_mosaic.version = 11 : i64} {
  func.func @_one_neuron_kernel(%arg0: i32, %arg1: memref<1024x128xf32, #tpu.memory_space<vmem>>, %arg2: memref<1xf32, #tpu.memory_space<smem>>, %arg3: memref<1xf32, #tpu.memory_space<smem>>, %arg4: memref<1024x128xf32, #tpu.memory_space<vmem>>) attributes {dimension_semantics = [#tpu.dimension_semantics<parallel>], iteration_bounds = array<i64: 2>, scalar_prefetch = 0 : i64, scratch_operands = 0 : i64, tpu.core_type = #tpu.core_type<tc>, window_params = [{transform_indices = @transform_0, window_bounds = array<i64: 1024, 128>}, {transform_indices = @transform_1, window_bounds = array<i64: 1>}, {transform_indices = @transform_2, window_bounds = array<i64: 1>}, {transform_indices = @transform_3, window_bounds = array<i64: 1024, 128>}]} {
    %c0 = arith.constant 0 : index
    %c0_0 = arith.constant 0 : index
    %0 = vector.load %arg1[%c0, %c0_0] : memref<1024x128xf32, #tpu.memory_space<vmem>>, vector<1024x128xf32>
    %c0_1 = arith.constant 0 : index
    %1 = memref.load %arg2[%c0_1] : memref<1xf32, #tpu.memory_space<smem>>
    %2 = vector.broadcast %1 : f32 to vector<1024x128xf32>
    %3 = arith.mulf %0, %2 : vector<1024x128xf32>
    %c0_2 = arith.constant 0 : index
    %4 = memref.load %arg3[%c0_2] : memref<1xf32, #tpu.memory_space<smem>>
    %5 = vector.broadcast %4 : f32 to vector<1024x128xf32>
    %6 = arith.addf %3, %5 : vector<1024x128xf32>
    %c0_3 = arith.constant 0 : index
    %c0_4 = arith.constant 0 : index
    %7 = vector.load %arg4[%c0_3, %c0_4] : memref<1024x128xf32, #tpu.memory_space<vmem>>, vector<1024x128xf32>
    tpu.vector_store %arg4[%c0_3, %c0_4], %6 {strides = array<i32>} : memref<1024x128xf32, #tpu.memory_space<vmem>>, vector<1024x128xf32>,
    return
  }
  func.func @transform_0(%arg0: i32) -> (i32, i32) {
    %c0_i32 = arith.constant 0 : i32
    %c0_i32_0 = arith.constant 0 : i32
    return %arg0, %c0_i32 : i32, i32
  }
  func.func @transform_1(%arg0: i32) -> i32 {
    %c0_i32 = arith.constant 0 : i32
    %c0_i32_0 = arith.constant 0 : i32
    return %c0_i32 : i32
  }
  func.func @transform_2(%arg0: i32) -> i32 {
    %c0_i32 = arith.constant 0 : i32
    %c0_i32_0 = arith.constant 0 : i32
    return %c0_i32 : i32
  }
  func.func @transform_3(%arg0: i32) -> (i32, i32) {
    %c0_i32 = arith.constant 0 : i32
    %c0_i32_0 = arith.constant 0 : i32
    return %arg0, %c0_i32 : i32, i32
  }
}

</mosaic_0001>

<bundles_post_ra>
// kernel: one_neuron_linear.1
= control target key start
LH: loop header
LB: loop body
LE: loop exit
PB: predicated region body
PF: predicated region fallthrough
CT: control target
= control target key end

     0   :  { %s1679_s0 = inlined_call_operand.hbm [shape: f32[2048,128], index: 0, kind: input, shape index: {}]   ;;  %s1680_s1 = inlined_call_operand.<no memory space> [shape: f32[1], index: 1, kind: input, shape index: {}]   ;;  %s1681_s2 = inlined_call_operand.<no memory space> [shape: f32[1], index: 2, kind: input, shape index: {}]   ;;  %s1682_s3 = inlined_call_operand.hbm [shape: f32[2048,128], index: 3, kind: output, shape index: {}]  }
   0x1   :  { %8 = sst [smem:[#allocation2]] %s1680_s1 }
   0x2   :  { %9 = sst [smem:[#allocation3]] %s1681_s2 }
   0x3   :  { %10 = vsyncpa [#allocation5], 0 }
   0x4   :  { %12 = vsyncpa [#allocation5 + $0x1], 0 }
   0x5   :  { %13 = vsyncpa [#allocation6], 0 }
   0x6   :  { %15 = vsyncpa [#allocation6 + $0x1], 0  ;;  %s992_s16 = smov 0   ;;  %s994_s17 = smov 0  }
   0x7   :  { %s996_s18 = smov 0   ;;  %s998_s19 = smov 0  }
   0x8 LB: > { %s1013_s1 = sadd.s32 4294967295, %s958_s19   ;;  %s796_s2 = sadd.s32 4294967294, %s958_s19   ;;  %s958_s19 = sphi %s998_s19, %s1695_s19   ;;  %s954_s18 = sphi %s996_s18, %s1694_s18   ;;  %s950_s17 = sphi %s994_s17, %s1693_s17   ;;  %s946_s16 = sphi %s992_s16, %s1692_s16  }
   0x9   : > { %s1017_s20 = sadd.s32 1, %s958_s19   ;;  %s28_s21 = sadd.s32 1, %s954_s18 }
   0xa   : > { %s25_s22 = ssub.s32 %s958_s19, %s1017_s20  ;;  %p35_p0 = scmp.ne.s32.totalorder %s954_s18, %s950_s17 }
   0xb   : > { %p26_p1 = scmp.eq.s32.totalorder %s25_s22, 0  ;;  %p36_p2 = scmp.eq.s32.totalorder %s958_s19, 0 }
   0xc   : > { %p41_p3 = scmp.ne.s32.totalorder %s950_s17, %s946_s16  ;;  %p42_p4 = scmp.eq.s32.totalorder %s1013_s1, 0 }
   0xd   : > { %s1029_s23 = scalar_select %p26_p1, %s954_s18, %s28_s21  }
   0xe   : > { %p1031_p5 = por %p36_p2, %p35_p0  ;;  %p1035_p6 = por %p42_p4, %p41_p3 }
   0xf   : > { %p107_p7 = scmp.eq.s32.totalorder %s1013_s1, 1  ;;  %p113_p8 = scmp.eq.s32.totalorder %s796_s2, 1 }
  0x10   : > { %p824_p10 = scmp.lt.s32.totalorder %s958_s19, 2  ;;  %s139_s28 = sand.u32 1, %s954_s18  }
  0x11   : > { %p1042_p11 = por %p107_p7, %p35_p0  ;;  %p1046_p12 = por %p113_p8, %p41_p3 }
  0x12   : > { %s810_s29 = sshll.u32 %s958_s19, 14  ;;  %s799_s30 = sshll.u32 %s139_s28, 10 }
  0x13   : > { %s1686_s26 = scalar_select %p1042_p11, 1, 0 }
  0x14   : > { %s1687_s27 = scalar_select %p1046_p12, 1, 0 }
  0x15   : > { %s1055_s6 = scalar_lea.hbm %s1679_s0, %s810_s29  ;;  %s143_s7 = scalar_lea.vmem [#allocation4], %s799_s30 }
  0x16   : > { %s150_s8 = sshll.u32 %s143_s7, 4  ;;  %p1059_p13 = pnand %p824_p10, %p1031_p5  ;;  %s1063_s8 = int_to_ptr.vmem [resolvable:$true] %s150_s8 }
  0x17   : > { %s1065_s10 = scalar_lea.sflag [#allocation5], %s139_s28  ;;  %s862_s11 = scalar_lea.hbm %s1055_s6, 16384 }
  0x18   : > { %p863_p0 = scmp.ne.s32.totalorder %s1055_s6, %s862_s11  ;;  %p864_p1 = pneg %p1059_p13 }
  0x19   : > { %s867_s14 = scalar_lea.hbm %s1679_s0, 32768  ;;  %p868_p4 = scmp.lt.u32.totalorder %s1055_s6, %s1679_s0 }
  0x1a   : > { %p865_p2 = pnand %p864_p1, %p863_p0  ;;  %p869_p5 = scmp.lt.u32.totalorder %s867_s14, %s862_s11 }
  0x1b   : > { %p871_p8 = scmp.lt.u32.totalorder %s862_s11, %s1055_s6 }
  0x1c   : > { %p866_p3 = pneg %p865_p2  ;;  %p870_p7 = por %p869_p5, %p868_p4 }
  0x1e   : > { %p872_p10 = por %p871_p8, %p870_p7 }
  0x20   : > { %p873_p9 = pnand %p872_p10, %p866_p3 }
  0x22   : > { %876 = shalt.err (!%p873_p9)
}
  0x23   : > { %s877_s21 = scalar_lea.vmem %s1063_s8, 16384  ;;  %s960_s22 = smov [#allocation4]  }
  0x24   : > { %p878_p0 = scmp.ne.s32.totalorder %s1063_s8, %s877_s21  ;;  %s882_s24 = sshll.u32 %s960_s22, 4  ;;  %s883_s24 = int_to_ptr.vmem [resolvable:$false] %s882_s24 }
  0x25   : > { %s884_s28 = scalar_lea.vmem %s883_s24, 32768  ;;  %p885_p11 = scmp.lt.s32.totalorder %s1063_s8, %s883_s24 }
  0x26   : > { %p880_p2 = pnand %p878_p0, %p864_p1  ;;  %p886_p4 = scmp.lt.s32.totalorder %s884_s28, %s877_s21 }
  0x28   : > { %p881_p12 = pneg %p880_p2  ;;  %p887_p5 = por %p886_p4, %p885_p11 }
  0x2a   : > { %p888_p7 = pnand %p887_p5, %p881_p12 }
  0x2c   : > { %891 = shalt.err (!%p888_p7)
}
  0x2d   : > { %s961_s29 = smov 128   ;;  %s962_s30 = smov 8  }
  0x2e   : > { %819 = dma.hbm_to_vmem [thread:$0]  (!%p1059_p13), %s1055_s6, 16384, %s1063_s8, %s1065_s10, %s961_s29, %s961_s29, %s962_s30  }
  0x2f   : > { %p802_p9 = scmp.ge.s32.totalorder %s958_s19, 1  ;;  %p158_p1 = scmp.lt.s32.totalorder %s958_s19, 3 }
  0x31   : > { %p159_p3 = pnand %p802_p9, %p158_p1 }
  0x32   : > { %s1096_s4 = sand.u32 (!%p159_p3), 1, %s950_s17  }
  0x33   : > { %162 = sbr.rel (%p159_p3) target bundleno = 160 (0xa0), region = 32  ;;  %s803_s5 = sshll.u32 (!%p159_p3), %s1096_s4, 10 }
  0x34   : > { %s165_s7 = scalar_lea.sflag (!%p159_p3), [#allocation5], %s1096_s4  ;;  %s1102_s11 = scalar_lea.vmem (!%p159_p3), [#allocation4], %s803_s5 }
  0x3a   : > { %937 = dma.done.wait (%p1035_p6), %s165_s7, 16384  }
  0x3b   : > { %939 = vsyncadd (%p1035_p6), %s165_s7, 4294950912  ;;  %s321_s6 = sld [smem:[#allocation2]]  ;;  %v193_v0 = vld [vmem:[%s1102_s11] sm:$0xff]  ;;  %v194_v3 = vld [vmem:[%s1102_s11 + $0x8] sm:$0xff]  ;;  %s1141_s25 = scalar_lea.vmem [#allocation7], %s803_s5 }
  0x3c   : > { %s451_s8 = sld [smem:[#allocation3]]  ;;  %v195_v6 = vld [vmem:[%s1102_s11 + $0x10] sm:$0xff]  ;;  %v196_v7 = vld [vmem:[%s1102_s11 + $0x18] sm:$0xff]  ;;  %v197_v8 = vld [vmem:[%s1102_s11 + $0x20] sm:$0xff]  ;;  %s811_s9 = sshll.u32 %s1013_s1, 14 }
  0x3d   : > { %v198_v12 = vld [vmem:[%s1102_s11 + $0x28] sm:$0xff]  ;;  %v199_v13 = vld [vmem:[%s1102_s11 + $0x30] sm:$0xff]  ;;  %v200_v14 = vld [vmem:[%s1102_s11 + $0x38] sm:$0xff]  ;;  %s723_s10 = sshll.u32 %s1141_s25, 4  ;;  %s1626_s13 = scalar_lea.hbm %s1682_s3, %s811_s9  ;;  %s1628_s10 = int_to_ptr.vmem [resolvable:$true] %s723_s10 }
  0x3e   : > { %v201_v19 = vld [vmem:[%s1102_s11 + $0x40] sm:$0xff]  ;;  %v202_v20 = vld [vmem:[%s1102_s11 + $0x48] sm:$0xff]  ;;  %v203_v21 = vld [vmem:[%s1102_s11 + $0x50] sm:$0xff]  ;;  %s710_s14 = scalar_lea.sflag [#allocation6], %s1096_s4  ;;  %s892_s15 = scalar_lea.vmem %s1628_s10, 16384 }
  0x3f   : > { %v204_v26 = vld [vmem:[%s1102_s11 + $0x58] sm:$0xff]  ;;  %v205_v27 = vld [vmem:[%s1102_s11 + $0x60] sm:$0xff]  ;;  %v206_v28 = vld [vmem:[%s1102_s11 + $0x68] sm:$0xff]  ;;  %p893_p6 = scmp.ne.s32.totalorder %s1628_s10, %s892_s15  ;;  %p1689_p11 = scmp.ne.s32.totalorder %s1686_s26, 0 }
  0x40   : > { %v207_v33 = vld [vmem:[%s1102_s11 + $0x70] sm:$0xff]  ;;  %v208_v34 = vld [vmem:[%s1102_s11 + $0x78] sm:$0xff]  ;;  %v209_v39 = vld [vmem:[%s1102_s11 + $0x80] sm:$0xff]  ;;  %s963_s2 = smov [#allocation7]  }
  0x41   : > { %v1109_v1 = vstv %s321_s6  ;;  %v210_v40 = vld [vmem:[%s1102_s11 + $0x88] sm:$0xff]  ;;  %v211_v45 = vld [vmem:[%s1102_s11 + $0x90] sm:$0xff]  ;;  %v212_v46 = vld [vmem:[%s1102_s11 + $0x98] sm:$0xff]  ;;  %p894_p12 = pnand %p893_p6, %p1689_p11  ;;  %s896_s21 = sshll.u32 %s963_s2, 4  ;;  %s897_s21 = int_to_ptr.vmem [resolvable:$false] %s896_s21 }
  0x42   : > { %v1111_v2 = vstv %s451_s8  ;;  %v323_v4 = vmul.f32 %v1109_v1, %v193_v0  ;;  %v324_v5 = vmul.f32 %v1109_v1, %v194_v3  ;;  %v325_v9 = vmul.f32 %v1109_v1, %v195_v6  ;;  %v213_v47 = vld [vmem:[%s1102_s11 + $0xa0] sm:$0xff]  ;;  %v214_v52 = vld [vmem:[%s1102_s11 + $0xa8] sm:$0xff]  ;;  %v215_v53 = vld [vmem:[%s1102_s11 + $0xb0] sm:$0xff]  ;;  %s898_s22 = scalar_lea.vmem %s897_s21, 32768  ;;  %p899_p8 = scmp.lt.s32.totalorder %s1628_s10, %s897_s21 }
  0x43   : > { %v326_v10 = vmul.f32 %v1109_v1, %v196_v7  ;;  %v327_v11 = vmul.f32 %v1109_v1, %v197_v8  ;;  %v328_v17 = vmul.f32 %v1109_v1, %v198_v12  ;;  %v329_v18 = vmul.f32 %v1109_v1, %v199_v13  ;;  %v216_v58 = vld [vmem:[%s1102_s11 + $0xb8] sm:$0xff]  ;;  %v217_v63 = vld [vmem:[%s1102_s11 + $0xc0] sm:$0xff]  ;;  %v218_v0 = vld [vmem:[%s1102_s11 + $0xc8] sm:$0xff]  ;;  %p895_p13 = pneg %p894_p12  ;;  %p900_p10 = scmp.lt.s32.totalorder %s898_s22, %s892_s15 }
  0x44   : > { %v453_v15 = vadd.f32 %v1111_v2, %v323_v4  ;;  %v454_v16 = vadd.f32 %v1111_v2, %v324_v5  ;;  %v455_v22 = vadd.f32 %v1111_v2, %v325_v9  ;;  %v330_v25 = vmul.f32 %v1109_v1, %v200_v14  ;;  %v219_v7 = vld [vmem:[%s1102_s11 + $0xd0] sm:$0xff]  ;;  %v220_v8 = vld [vmem:[%s1102_s11 + $0xd8] sm:$0xff]  ;;  %v221_v9 = vld [vmem:[%s1102_s11 + $0xe0] sm:$0xff] }
  0x45   : > { %v456_v23 = vadd.f32 %v1111_v2, %v326_v10  ;;  %v457_v24 = vadd.f32 %v1111_v2, %v327_v11  ;;  %v458_v29 = vadd.f32 %v1111_v2, %v328_v17  ;;  %v459_v30 = vadd.f32 %v1111_v2, %v329_v18  ;;  %v222_v14 = vld [vmem:[%s1102_s11 + $0xe8] sm:$0xff]  ;;  %p901_p0 = por %p900_p10, %p899_p8 }
  0x46   : > { %581 = vst [vmem:[%s1141_s25] sm:$0xff] %v453_v15  ;;  %582 = vst [vmem:[%s1141_s25 + $0x8] sm:$0xff] %v454_v16  ;;  %v331_v31 = vmul.f32 %v1109_v1, %v201_v19  ;;  %v332_v32 = vmul.f32 %v1109_v1, %v202_v20  ;;  %v460_v35 = vadd.f32 %v1111_v2, %v330_v25  ;;  %v223_v15 = vld [vmem:[%s1102_s11 + $0xf0] sm:$0xff]  ;;  %v224_v20 = vld [vmem:[%s1102_s11 + $0xf8] sm:$0xff] }
  0x47   : > { %583 = vst [vmem:[%s1141_s25 + $0x10] sm:$0xff] %v455_v22  ;;  %584 = vst [vmem:[%s1141_s25 + $0x18] sm:$0xff] %v456_v23  ;;  %v333_v36 = vmul.f32 %v1109_v1, %v203_v21  ;;  %v334_v37 = vmul.f32 %v1109_v1, %v204_v26  ;;  %v335_v38 = vmul.f32 %v1109_v1, %v205_v27  ;;  %v225_v25 = vld [vmem:[%s1102_s11 + $0x100] sm:$0xff]  ;;  %v226_v26 = vld [vmem:[%s1102_s11 + $0x108] sm:$0xff]  ;;  %p902_p2 = pnand %p901_p0, %p895_p13 }
  0x48   : > { %585 = vst [vmem:[%s1141_s25 + $0x20] sm:$0xff] %v457_v24  ;;  %586 = vst [vmem:[%s1141_s25 + $0x28] sm:$0xff] %v458_v29  ;;  %v461_v41 = vadd.f32 %v1111_v2, %v331_v31  ;;  %v462_v42 = vadd.f32 %v1111_v2, %v332_v32  ;;  %v336_v43 = vmul.f32 %v1109_v1, %v206_v28  ;;  %v227_v31 = vld [vmem:[%s1102_s11 + $0x110] sm:$0xff]  ;;  %v228_v32 = vld [vmem:[%s1102_s11 + $0x118] sm:$0xff] }
  0x49   : > { %587 = vst [vmem:[%s1141_s25 + $0x30] sm:$0xff] %v459_v30  ;;  %v337_v44 = vmul.f32 %v1109_v1, %v207_v33  ;;  %588 = vst [vmem:[%s1141_s25 + $0x38] sm:$0xff] %v460_v35  ;;  %v463_v48 = vadd.f32 %v1111_v2, %v333_v36  ;;  %v464_v49 = vadd.f32 %v1111_v2, %v334_v37  ;;  %v229_v33 = vld [vmem:[%s1102_s11 + $0x120] sm:$0xff] }
  0x4a   : > { %v465_v50 = vadd.f32 %v1111_v2, %v335_v38  ;;  %v338_v51 = vmul.f32 %v1109_v1, %v208_v34  ;;  %589 = vst [vmem:[%s1141_s25 + $0x40] sm:$0xff] %v461_v41  ;;  %590 = vst [vmem:[%s1141_s25 + $0x48] sm:$0xff] %v462_v42  ;;  %v466_v54 = vadd.f32 %v1111_v2, %v336_v43  ;;  %v230_v38 = vld [vmem:[%s1102_s11 + $0x128] sm:$0xff] }
  0x4b   : > { %v467_v55 = vadd.f32 %v1111_v2, %v337_v44  ;;  %v339_v56 = vmul.f32 %v1109_v1, %v209_v39  ;;  %v340_v57 = vmul.f32 %v1109_v1, %v210_v40  ;;  %591 = vst [vmem:[%s1141_s25 + $0x50] sm:$0xff] %v463_v48  ;;  %592 = vst [vmem:[%s1141_s25 + $0x58] sm:$0xff] %v464_v49  ;;  %v231_v39 = vld [vmem:[%s1102_s11 + $0x130] sm:$0xff]  ;;  %v232_v44 = vld [vmem:[%s1102_s11 + $0x138] sm:$0xff] }
  0x4c   : > { %593 = vst [vmem:[%s1141_s25 + $0x60] sm:$0xff] %v465_v50  ;;  %v468_v59 = vadd.f32 %v1111_v2, %v338_v51  ;;  %v341_v60 = vmul.f32 %v1109_v1, %v211_v45  ;;  %v342_v61 = vmul.f32 %v1109_v1, %v212_v46  ;;  %v343_v62 = vmul.f32 %v1109_v1, %v213_v47  ;;  %v233_v49 = vld [vmem:[%s1102_s11 + $0x140] sm:$0xff]  ;;  %v234_v50 = vld [vmem:[%s1102_s11 + $0x148] sm:$0xff] }
  0x4d   : > { %594 = vst [vmem:[%s1141_s25 + $0x68] sm:$0xff] %v466_v54  ;;  %595 = vst [vmem:[%s1141_s25 + $0x70] sm:$0xff] %v467_v55  ;;  %v469_v3 = vadd.f32 %v1111_v2, %v339_v56  ;;  %v470_v4 = vadd.f32 %v1111_v2, %v340_v57  ;;  %v344_v5 = vmul.f32 %v1109_v1, %v214_v52  ;;  %v235_v55 = vld [vmem:[%s1102_s11 + $0x150] sm:$0xff]  ;;  %v236_v56 = vld [vmem:[%s1102_s11 + $0x158] sm:$0xff] }
  0x4e   : > { %v345_v6 = vmul.f32 %v1109_v1, %v215_v53  ;;  %596 = vst [vmem:[%s1141_s25 + $0x78] sm:$0xff] %v468_v59  ;;  %v471_v10 = vadd.f32 %v1111_v2, %v341_v60  ;;  %v472_v11 = vadd.f32 %v1111_v2, %v342_v61  ;;  %v473_v12 = vadd.f32 %v1111_v2, %v343_v62  ;;  %v237_v57 = vld [vmem:[%s1102_s11 + $0x160] sm:$0xff]  ;;  %v238_v62 = vld [vmem:[%s1102_s11 + $0x168] sm:$0xff] }
  0x4f   : > { %v346_v13 = vmul.f32 %v1109_v1, %v216_v58  ;;  %597 = vst [vmem:[%s1141_s25 + $0x80] sm:$0xff] %v469_v3  ;;  %598 = vst [vmem:[%s1141_s25 + $0x88] sm:$0xff] %v470_v4  ;;  %v474_v16 = vadd.f32 %v1111_v2, %v344_v5  ;;  %v347_v18 = vmul.f32 %v1109_v1, %v217_v63  ;;  %v239_v63 = vld [vmem:[%s1102_s11 + $0x170] sm:$0xff] }
  0x50   : > { %v475_v17 = vadd.f32 %v1111_v2, %v345_v6  ;;  %v348_v19 = vmul.f32 %v1109_v1, %v218_v0  ;;  %599 = vst [vmem:[%s1141_s25 + $0x90] sm:$0xff] %v471_v10  ;;  %600 = vst [vmem:[%s1141_s25 + $0x98] sm:$0xff] %v472_v11  ;;  %v349_v22 = vmul.f32 %v1109_v1, %v219_v7  ;;  %v240_v6 = vld [vmem:[%s1102_s11 + $0x178] sm:$0xff]  ;;  %v241_v11 = vld [vmem:[%s1102_s11 + $0x180] sm:$0xff] }
  0x51   : > { %601 = vst [vmem:[%s1141_s25 + $0xa0] sm:$0xff] %v473_v12  ;;  %v476_v21 = vadd.f32 %v1111_v2, %v346_v13  ;;  %v350_v23 = vmul.f32 %v1109_v1, %v220_v8  ;;  %v351_v24 = vmul.f32 %v1109_v1, %v221_v9  ;;  %602 = vst [vmem:[%s1141_s25 + $0xa8] sm:$0xff] %v474_v16  ;;  %v242_v12 = vld [vmem:[%s1102_s11 + $0x188] sm:$0xff] }
  0x52   : > { %603 = vst [vmem:[%s1141_s25 + $0xb0] sm:$0xff] %v475_v17  ;;  %v477_v27 = vadd.f32 %v1111_v2, %v347_v18  ;;  %v478_v28 = vadd.f32 %v1111_v2, %v348_v19  ;;  %v352_v29 = vmul.f32 %v1109_v1, %v222_v14  ;;  %v353_v30 = vmul.f32 %v1109_v1, %v223_v15  ;;  %v243_v17 = vld [vmem:[%s1102_s11 + $0x190] sm:$0xff]  ;;  %v244_v18 = vld [vmem:[%s1102_s11 + $0x198] sm:$0xff]  ;;  %v245_v19 = vld [vmem:[%s1102_s11 + $0x1a0] sm:$0xff] }
  0x53   : > { %604 = vst [vmem:[%s1141_s25 + $0xb8] sm:$0xff] %v476_v21  ;;  %v479_v34 = vadd.f32 %v1111_v2, %v349_v22  ;;  %v480_v35 = vadd.f32 %v1111_v2, %v350_v23  ;;  %v481_v36 = vadd.f32 %v1111_v2, %v351_v24  ;;  %v354_v37 = vmul.f32 %v1109_v1, %v224_v20  ;;  %v246_v24 = vld [vmem:[%s1102_s11 + $0x1a8] sm:$0xff] }
  0x54   : > { %605 = vst [vmem:[%s1141_s25 + $0xc0] sm:$0xff] %v477_v27  ;;  %606 = vst [vmem:[%s1141_s25 + $0xc8] sm:$0xff] %v478_v28  ;;  %v482_v40 = vadd.f32 %v1111_v2, %v352_v29  ;;  %v483_v41 = vadd.f32 %v1111_v2, %v353_v30  ;;  %v355_v42 = vmul.f32 %v1109_v1, %v225_v25  ;;  %v247_v25 = vld [vmem:[%s1102_s11 + $0x1b0] sm:$0xff]  ;;  %v248_v30 = vld [vmem:[%s1102_s11 + $0x1b8] sm:$0xff] }
  0x55   : > { %v356_v43 = vmul.f32 %v1109_v1, %v226_v26  ;;  %607 = vst [vmem:[%s1141_s25 + $0xd0] sm:$0xff] %v479_v34  ;;  %608 = vst [vmem:[%s1141_s25 + $0xd8] sm:$0xff] %v480_v35  ;;  %v484_v45 = vadd.f32 %v1111_v2, %v354_v37  ;;  %v357_v46 = vmul.f32 %v1109_v1, %v227_v31  ;;  %v249_v35 = vld [vmem:[%s1102_s11 + $0x1c0] sm:$0xff] }
  0x56   : > { %609 = vst [vmem:[%s1141_s25 + $0xe0] sm:$0xff] %v481_v36  ;;  %v358_v47 = vmul.f32 %v1109_v1, %v228_v32  ;;  %v359_v48 = vmul.f32 %v1109_v1, %v229_v33  ;;  %610 = vst [vmem:[%s1141_s25 + $0xe8] sm:$0xff] %v482_v40  ;;  %v485_v51 = vadd.f32 %v1111_v2, %v355_v42  ;;  %v250_v36 = vld [vmem:[%s1102_s11 + $0x1c8] sm:$0xff]  ;;  %v252_v42 = vld [vmem:[%s1102_s11 + $0x1d8] sm:$0xff] }
  0x57   : > { %611 = vst [vmem:[%s1141_s25 + $0xf0] sm:$0xff] %v483_v41  ;;  %v486_v52 = vadd.f32 %v1111_v2, %v356_v43  ;;  %v360_v53 = vmul.f32 %v1109_v1, %v230_v38  ;;  %v361_v54 = vmul.f32 %v1109_v1, %v231_v39  ;;  %612 = vst [vmem:[%s1141_s25 + $0xf8] sm:$0xff] %v484_v45  ;;  %v251_v41 = vld [vmem:[%s1102_s11 + $0x1d0] sm:$0xff]  ;;  %v253_v43 = vld [vmem:[%s1102_s11 + $0x1e0] sm:$0xff] }
  0x58   : > { %v487_v58 = vadd.f32 %v1111_v2, %v357_v46  ;;  %v488_v59 = vadd.f32 %v1111_v2, %v358_v47  ;;  %v489_v60 = vadd.f32 %v1111_v2, %v359_v48  ;;  %v362_v61 = vmul.f32 %v1109_v1, %v232_v44  ;;  %613 = vst [vmem:[%s1141_s25 + $0x100] sm:$0xff] %v485_v51  ;;  %v254_v48 = vld [vmem:[%s1102_s11 + $0x1e8] sm:$0xff] }
  0x59   : > { %614 = vst [vmem:[%s1141_s25 + $0x108] sm:$0xff] %v486_v52  ;;  %v490_v0 = vadd.f32 %v1111_v2, %v360_v53  ;;  %v491_v3 = vadd.f32 %v1111_v2, %v361_v54  ;;  %v363_v4 = vmul.f32 %v1109_v1, %v233_v49  ;;  %v364_v5 = vmul.f32 %v1109_v1, %v234_v50  ;;  %v255_v49 = vld [vmem:[%s1102_s11 + $0x1f0] sm:$0xff]  ;;  %v256_v54 = vld [vmem:[%s1102_s11 + $0x1f8] sm:$0xff] }
  0x5a   : > { %615 = vst [vmem:[%s1141_s25 + $0x110] sm:$0xff] %v487_v58  ;;  %616 = vst [vmem:[%s1141_s25 + $0x118] sm:$0xff] %v488_v59  ;;  %v492_v7 = vadd.f32 %v1111_v2, %v362_v61  ;;  %v365_v8 = vmul.f32 %v1109_v1, %v235_v55  ;;  %v366_v9 = vmul.f32 %v1109_v1, %v236_v56  ;;  %v257_v59 = vld [vmem:[%s1102_s11 + $0x200] sm:$0xff] }
  0x5b   : > { %617 = vst [vmem:[%s1141_s25 + $0x120] sm:$0xff] %v489_v60  ;;  %v367_v10 = vmul.f32 %v1109_v1, %v237_v57  ;;  %618 = vst [vmem:[%s1141_s25 + $0x128] sm:$0xff] %v490_v0  ;;  %v493_v13 = vadd.f32 %v1111_v2, %v363_v4  ;;  %v494_v14 = vadd.f32 %v1111_v2, %v364_v5  ;;  %v258_v60 = vld [vmem:[%s1102_s11 + $0x208] sm:$0xff]  ;;  %v260_v4 = vld [vmem:[%s1102_s11 + $0x218] sm:$0xff] }
  0x5c   : > { %619 = vst [vmem:[%s1141_s25 + $0x130] sm:$0xff] %v491_v3  ;;  %v368_v15 = vmul.f32 %v1109_v1, %v238_v62  ;;  %v369_v16 = vmul.f32 %v1109_v1, %v239_v63  ;;  %620 = vst [vmem:[%s1141_s25 + $0x138] sm:$0xff] %v492_v7  ;;  %v495_v20 = vadd.f32 %v1111_v2, %v365_v8  ;;  %v259_v3 = vld [vmem:[%s1102_s11 + $0x210] sm:$0xff]  ;;  %v261_v5 = vld [vmem:[%s1102_s11 + $0x220] sm:$0xff] }
  0x5d   : > { %v496_v21 = vadd.f32 %v1111_v2, %v366_v9  ;;  %v497_v22 = vadd.f32 %v1111_v2, %v367_v10  ;;  %v370_v23 = vmul.f32 %v1109_v1, %v240_v6  ;;  %621 = vst [vmem:[%s1141_s25 + $0x140] sm:$0xff] %v493_v13  ;;  %622 = vst [vmem:[%s1141_s25 + $0x148] sm:$0xff] %v494_v14  ;;  %v262_v10 = vld [vmem:[%s1102_s11 + $0x228] sm:$0xff] }
  0x5e   : > { %v498_v26 = vadd.f32 %v1111_v2, %v368_v15  ;;  %v499_v27 = vadd.f32 %v1111_v2, %v369_v16  ;;  %v371_v28 = vmul.f32 %v1109_v1, %v241_v11  ;;  %v372_v29 = vmul.f32 %v1109_v1, %v242_v12  ;;  %623 = vst [vmem:[%s1141_s25 + $0x150] sm:$0xff] %v495_v20  ;;  %v263_v11 = vld [vmem:[%s1102_s11 + $0x230] sm:$0xff]  ;;  %v264_v16 = vld [vmem:[%s1102_s11 + $0x238] sm:$0xff] }
  0x5f   : > { %624 = vst [vmem:[%s1141_s25 + $0x158] sm:$0xff] %v496_v21  ;;  %625 = vst [vmem:[%s1141_s25 + $0x160] sm:$0xff] %v497_v22  ;;  %v500_v31 = vadd.f32 %v1111_v2, %v370_v23  ;;  %v373_v32 = vmul.f32 %v1109_v1, %v243_v17  ;;  %v374_v33 = vmul.f32 %v1109_v1, %v244_v18  ;;  %v265_v21 = vld [vmem:[%s1102_s11 + $0x240] sm:$0xff]  ;;  %v266_v22 = vld [vmem:[%s1102_s11 + $0x248] sm:$0xff] }
  0x60   : > { %v375_v34 = vmul.f32 %v1109_v1, %v245_v19  ;;  %626 = vst [vmem:[%s1141_s25 + $0x168] sm:$0xff] %v498_v26  ;;  %627 = vst [vmem:[%s1141_s25 + $0x170] sm:$0xff] %v499_v27  ;;  %v501_v37 = vadd.f32 %v1111_v2, %v371_v28  ;;  %v502_v38 = vadd.f32 %v1111_v2, %v372_v29  ;;  %v267_v27 = vld [vmem:[%s1102_s11 + $0x250] sm:$0xff]  ;;  %v268_v28 = vld [vmem:[%s1102_s11 + $0x258] sm:$0xff] }
  0x61   : > { %v376_v39 = vmul.f32 %v1109_v1, %v246_v24  ;;  %v377_v40 = vmul.f32 %v1109_v1, %v247_v25  ;;  %628 = vst [vmem:[%s1141_s25 + $0x178] sm:$0xff] %v500_v31  ;;  %v503_v44 = vadd.f32 %v1111_v2, %v373_v32  ;;  %v504_v45 = vadd.f32 %v1111_v2, %v374_v33  ;;  %v269_v29 = vld [vmem:[%s1102_s11 + $0x260] sm:$0xff] }
  0x62   : > { %v505_v46 = vadd.f32 %v1111_v2, %v375_v34  ;;  %v378_v47 = vmul.f32 %v1109_v1, %v248_v30  ;;  %629 = vst [vmem:[%s1141_s25 + $0x180] sm:$0xff] %v501_v37  ;;  %630 = vst [vmem:[%s1141_s25 + $0x188] sm:$0xff] %v502_v38  ;;  %v379_v52 = vmul.f32 %v1109_v1, %v249_v35  ;;  %v270_v34 = vld [vmem:[%s1102_s11 + $0x268] sm:$0xff]  ;;  %v271_v35 = vld [vmem:[%s1102_s11 + $0x270] sm:$0xff] }
  0x63   : > { %v506_v50 = vadd.f32 %v1111_v2, %v376_v39  ;;  %v507_v51 = vadd.f32 %v1111_v2, %v377_v40  ;;  %v380_v53 = vmul.f32 %v1109_v1, %v250_v36  ;;  %631 = vst [vmem:[%s1141_s25 + $0x190] sm:$0xff] %v503_v44  ;;  %632 = vst [vmem:[%s1141_s25 + $0x198] sm:$0xff] %v504_v45  ;;  %v272_v40 = vld [vmem:[%s1102_s11 + $0x278] sm:$0xff]  ;;  %v273_v45 = vld [vmem:[%s1102_s11 + $0x280] sm:$0xff] }
  0x64   : > { %633 = vst [vmem:[%s1141_s25 + $0x1a0] sm:$0xff] %v505_v46  ;;  %v508_v55 = vadd.f32 %v1111_v2, %v378_v47  ;;  %v381_v56 = vmul.f32 %v1109_v1, %v251_v41  ;;  %v382_v57 = vmul.f32 %v1109_v1, %v252_v42  ;;  %v383_v58 = vmul.f32 %v1109_v1, %v253_v43  ;;  %v274_v46 = vld [vmem:[%s1102_s11 + $0x288] sm:$0xff] }
  0x65   : > { %634 = vst [vmem:[%s1141_s25 + $0x1a8] sm:$0xff] %v506_v50  ;;  %635 = vst [vmem:[%s1141_s25 + $0x1b0] sm:$0xff] %v507_v51  ;;  %v509_v61 = vadd.f32 %v1111_v2, %v379_v52  ;;  %v510_v62 = vadd.f32 %v1111_v2, %v380_v53  ;;  %v384_v63 = vmul.f32 %v1109_v1, %v254_v48  ;;  %v275_v51 = vld [vmem:[%s1102_s11 + $0x290] sm:$0xff]  ;;  %v276_v52 = vld [vmem:[%s1102_s11 + $0x298] sm:$0xff] }
  0x66   : > { %v385_v0 = vmul.f32 %v1109_v1, %v255_v49  ;;  %636 = vst [vmem:[%s1141_s25 + $0x1b8] sm:$0xff] %v508_v55  ;;  %v511_v6 = vadd.f32 %v1111_v2, %v381_v56  ;;  %v512_v7 = vadd.f32 %v1111_v2, %v382_v57  ;;  %v513_v8 = vadd.f32 %v1111_v2, %v383_v58  ;;  %v277_v53 = vld [vmem:[%s1102_s11 + $0x2a0] sm:$0xff]  ;;  %v278_v58 = vld [vmem:[%s1102_s11 + $0x2a8] sm:$0xff] }
  0x67   : > { %v386_v9 = vmul.f32 %v1109_v1, %v256_v54  ;;  %637 = vst [vmem:[%s1141_s25 + $0x1c0] sm:$0xff] %v509_v61  ;;  %638 = vst [vmem:[%s1141_s25 + $0x1c8] sm:$0xff] %v510_v62  ;;  %v514_v12 = vadd.f32 %v1111_v2, %v384_v63  ;;  %v387_v14 = vmul.f32 %v1109_v1, %v257_v59  ;;  %v279_v59 = vld [vmem:[%s1102_s11 + $0x2b0] sm:$0xff] }
  0x68   : > { %v515_v13 = vadd.f32 %v1111_v2, %v385_v0  ;;  %v388_v15 = vmul.f32 %v1109_v1, %v258_v60  ;;  %639 = vst [vmem:[%s1141_s25 + $0x1d0] sm:$0xff] %v511_v6  ;;  %640 = vst [vmem:[%s1141_s25 + $0x1d8] sm:$0xff] %v512_v7  ;;  %v389_v18 = vmul.f32 %v1109_v1, %v259_v3  ;;  %v280_v0 = vld [vmem:[%s1102_s11 + $0x2b8] sm:$0xff]  ;;  %v281_v7 = vld [vmem:[%s1102_s11 + $0x2c0] sm:$0xff] }
  0x69   : > { %641 = vst [vmem:[%s1141_s25 + $0x1e0] sm:$0xff] %v513_v8  ;;  %v516_v17 = vadd.f32 %v1111_v2, %v386_v9  ;;  %v390_v19 = vmul.f32 %v1109_v1, %v260_v4  ;;  %v391_v20 = vmul.f32 %v1109_v1, %v261_v5  ;;  %642 = vst [vmem:[%s1141_s25 + $0x1e8] sm:$0xff] %v514_v12  ;;  %v282_v8 = vld [vmem:[%s1102_s11 + $0x2c8] sm:$0xff] }
  0x6a   : > { %643 = vst [vmem:[%s1141_s25 + $0x1f0] sm:$0xff] %v515_v13  ;;  %v517_v23 = vadd.f32 %v1111_v2, %v387_v14  ;;  %v518_v24 = vadd.f32 %v1111_v2, %v388_v15  ;;  %v392_v25 = vmul.f32 %v1109_v1, %v262_v10  ;;  %v393_v26 = vmul.f32 %v1109_v1, %v263_v11  ;;  %v283_v13 = vld [vmem:[%s1102_s11 + $0x2d0] sm:$0xff]  ;;  %v284_v14 = vld [vmem:[%s1102_s11 + $0x2d8] sm:$0xff]  ;;  %v285_v15 = vld [vmem:[%s1102_s11 + $0x2e0] sm:$0xff] }
  0x6b   : > { %644 = vst [vmem:[%s1141_s25 + $0x1f8] sm:$0xff] %v516_v17  ;;  %v519_v30 = vadd.f32 %v1111_v2, %v389_v18  ;;  %v520_v31 = vadd.f32 %v1111_v2, %v390_v19  ;;  %v521_v32 = vadd.f32 %v1111_v2, %v391_v20  ;;  %v394_v33 = vmul.f32 %v1109_v1, %v264_v16  ;;  %v286_v20 = vld [vmem:[%s1102_s11 + $0x2e8] sm:$0xff] }
  0x6c   : > { %645 = vst [vmem:[%s1141_s25 + $0x200] sm:$0xff] %v517_v23  ;;  %646 = vst [vmem:[%s1141_s25 + $0x208] sm:$0xff] %v518_v24  ;;  %v522_v36 = vadd.f32 %v1111_v2, %v392_v25  ;;  %v523_v37 = vadd.f32 %v1111_v2, %v393_v26  ;;  %v395_v38 = vmul.f32 %v1109_v1, %v265_v21  ;;  %v287_v21 = vld [vmem:[%s1102_s11 + $0x2f0] sm:$0xff]  ;;  %v288_v26 = vld [vmem:[%s1102_s11 + $0x2f8] sm:$0xff] }
  0x6d   : > { %v396_v39 = vmul.f32 %v1109_v1, %v266_v22  ;;  %647 = vst [vmem:[%s1141_s25 + $0x210] sm:$0xff] %v519_v30  ;;  %648 = vst [vmem:[%s1141_s25 + $0x218] sm:$0xff] %v520_v31  ;;  %v524_v41 = vadd.f32 %v1111_v2, %v394_v33  ;;  %v397_v42 = vmul.f32 %v1109_v1, %v267_v27  ;;  %v289_v31 = vld [vmem:[%s1102_s11 + $0x300] sm:$0xff] }
  0x6e   : > { %649 = vst [vmem:[%s1141_s25 + $0x220] sm:$0xff] %v521_v32  ;;  %v398_v43 = vmul.f32 %v1109_v1, %v268_v28  ;;  %v399_v44 = vmul.f32 %v1109_v1, %v269_v29  ;;  %650 = vst [vmem:[%s1141_s25 + $0x228] sm:$0xff] %v522_v36  ;;  %v525_v47 = vadd.f32 %v1111_v2, %v395_v38  ;;  %v290_v32 = vld [vmem:[%s1102_s11 + $0x308] sm:$0xff]  ;;  %v292_v38 = vld [vmem:[%s1102_s11 + $0x318] sm:$0xff] }
  0x6f   : > { %651 = vst [vmem:[%s1141_s25 + $0x230] sm:$0xff] %v523_v37  ;;  %v526_v48 = vadd.f32 %v1111_v2, %v396_v39  ;;  %v400_v49 = vmul.f32 %v1109_v1, %v270_v34  ;;  %v401_v50 = vmul.f32 %v1109_v1, %v271_v35  ;;  %652 = vst [vmem:[%s1141_s25 + $0x238] sm:$0xff] %v524_v41  ;;  %v291_v37 = vld [vmem:[%s1102_s11 + $0x310] sm:$0xff]  ;;  %v293_v39 = vld [vmem:[%s1102_s11 + $0x320] sm:$0xff] }
  0x70   : > { %v527_v54 = vadd.f32 %v1111_v2, %v397_v42  ;;  %v528_v55 = vadd.f32 %v1111_v2, %v398_v43  ;;  %v529_v56 = vadd.f32 %v1111_v2, %v399_v44  ;;  %v402_v57 = vmul.f32 %v1109_v1, %v272_v40  ;;  %653 = vst [vmem:[%s1141_s25 + $0x240] sm:$0xff] %v525_v47  ;;  %v294_v44 = vld [vmem:[%s1102_s11 + $0x328] sm:$0xff] }
  0x71   : > { %654 = vst [vmem:[%s1141_s25 + $0x248] sm:$0xff] %v526_v48  ;;  %v530_v60 = vadd.f32 %v1111_v2, %v400_v49  ;;  %v531_v61 = vadd.f32 %v1111_v2, %v401_v50  ;;  %v403_v62 = vmul.f32 %v1109_v1, %v273_v45  ;;  %v404_v63 = vmul.f32 %v1109_v1, %v274_v46  ;;  %v295_v45 = vld [vmem:[%s1102_s11 + $0x330] sm:$0xff]  ;;  %v296_v50 = vld [vmem:[%s1102_s11 + $0x338] sm:$0xff] }
  0x72   : > { %655 = vst [vmem:[%s1141_s25 + $0x250] sm:$0xff] %v527_v54  ;;  %656 = vst [vmem:[%s1141_s25 + $0x258] sm:$0xff] %v528_v55  ;;  %v532_v3 = vadd.f32 %v1111_v2, %v402_v57  ;;  %v405_v4 = vmul.f32 %v1109_v1, %v275_v51  ;;  %v406_v5 = vmul.f32 %v1109_v1, %v276_v52  ;;  %v297_v55 = vld [vmem:[%s1102_s11 + $0x340] sm:$0xff] }
  0x73   : > { %657 = vst [vmem:[%s1141_s25 + $0x260] sm:$0xff] %v529_v56  ;;  %v407_v6 = vmul.f32 %v1109_v1, %v277_v53  ;;  %658 = vst [vmem:[%s1141_s25 + $0x268] sm:$0xff] %v530_v60  ;;  %v533_v9 = vadd.f32 %v1111_v2, %v403_v62  ;;  %v534_v10 = vadd.f32 %v1111_v2, %v404_v63  ;;  %v298_v56 = vld [vmem:[%s1102_s11 + $0x348] sm:$0xff]  ;;  %v300_v62 = vld [vmem:[%s1102_s11 + $0x358] sm:$0xff] }
  0x74   : > { %659 = vst [vmem:[%s1141_s25 + $0x270] sm:$0xff] %v531_v61  ;;  %v408_v11 = vmul.f32 %v1109_v1, %v278_v58  ;;  %v409_v12 = vmul.f32 %v1109_v1, %v279_v59  ;;  %660 = vst [vmem:[%s1141_s25 + $0x278] sm:$0xff] %v532_v3  ;;  %v535_v16 = vadd.f32 %v1111_v2, %v405_v4  ;;  %v299_v61 = vld [vmem:[%s1102_s11 + $0x350] sm:$0xff]  ;;  %v301_v63 = vld [vmem:[%s1102_s11 + $0x360] sm:$0xff] }
  0x75   : > { %v536_v17 = vadd.f32 %v1111_v2, %v406_v5  ;;  %v537_v18 = vadd.f32 %v1111_v2, %v407_v6  ;;  %v410_v19 = vmul.f32 %v1109_v1, %v280_v0  ;;  %661 = vst [vmem:[%s1141_s25 + $0x280] sm:$0xff] %v533_v9  ;;  %662 = vst [vmem:[%s1141_s25 + $0x288] sm:$0xff] %v534_v10  ;;  %v302_v6 = vld [vmem:[%s1102_s11 + $0x368] sm:$0xff] }
  0x76   : > { %v538_v22 = vadd.f32 %v1111_v2, %v408_v11  ;;  %v539_v23 = vadd.f32 %v1111_v2, %v409_v12  ;;  %v411_v24 = vmul.f32 %v1109_v1, %v281_v7  ;;  %v412_v25 = vmul.f32 %v1109_v1, %v282_v8  ;;  %663 = vst [vmem:[%s1141_s25 + $0x290] sm:$0xff] %v535_v16  ;;  %v303_v7 = vld [vmem:[%s1102_s11 + $0x370] sm:$0xff]  ;;  %v304_v12 = vld [vmem:[%s1102_s11 + $0x378] sm:$0xff] }
  0x77   : > { %664 = vst [vmem:[%s1141_s25 + $0x298] sm:$0xff] %v536_v17  ;;  %665 = vst [vmem:[%s1141_s25 + $0x2a0] sm:$0xff] %v537_v18  ;;  %v540_v27 = vadd.f32 %v1111_v2, %v410_v19  ;;  %v413_v28 = vmul.f32 %v1109_v1, %v283_v13  ;;  %v414_v29 = vmul.f32 %v1109_v1, %v284_v14  ;;  %v305_v17 = vld [vmem:[%s1102_s11 + $0x380] sm:$0xff]  ;;  %v306_v18 = vld [vmem:[%s1102_s11 + $0x388] sm:$0xff] }
  0x78   : > { %v415_v30 = vmul.f32 %v1109_v1, %v285_v15  ;;  %666 = vst [vmem:[%s1141_s25 + $0x2a8] sm:$0xff] %v538_v22  ;;  %667 = vst [vmem:[%s1141_s25 + $0x2b0] sm:$0xff] %v539_v23  ;;  %v541_v33 = vadd.f32 %v1111_v2, %v411_v24  ;;  %v542_v34 = vadd.f32 %v1111_v2, %v412_v25  ;;  %v307_v23 = vld [vmem:[%s1102_s11 + $0x390] sm:$0xff]  ;;  %v308_v24 = vld [vmem:[%s1102_s11 + $0x398] sm:$0xff] }
  0x79   : > { %v416_v35 = vmul.f32 %v1109_v1, %v286_v20  ;;  %v417_v36 = vmul.f32 %v1109_v1, %v287_v21  ;;  %668 = vst [vmem:[%s1141_s25 + $0x2b8] sm:$0xff] %v540_v27  ;;  %v543_v40 = vadd.f32 %v1111_v2, %v413_v28  ;;  %v544_v41 = vadd.f32 %v1111_v2, %v414_v29  ;;  %v309_v25 = vld [vmem:[%s1102_s11 + $0x3a0] sm:$0xff] }
  0x7a   : > { %v545_v42 = vadd.f32 %v1111_v2, %v415_v30  ;;  %v418_v43 = vmul.f32 %v1109_v1, %v288_v26  ;;  %669 = vst [vmem:[%s1141_s25 + $0x2c0] sm:$0xff] %v541_v33  ;;  %670 = vst [vmem:[%s1141_s25 + $0x2c8] sm:$0xff] %v542_v34  ;;  %v419_v48 = vmul.f32 %v1109_v1, %v289_v31  ;;  %v310_v30 = vld [vmem:[%s1102_s11 + $0x3a8] sm:$0xff]  ;;  %v311_v31 = vld [vmem:[%s1102_s11 + $0x3b0] sm:$0xff] }
  0x7b   : > { %v546_v46 = vadd.f32 %v1111_v2, %v416_v35  ;;  %v547_v47 = vadd.f32 %v1111_v2, %v417_v36  ;;  %v420_v49 = vmul.f32 %v1109_v1, %v290_v32  ;;  %671 = vst [vmem:[%s1141_s25 + $0x2d0] sm:$0xff] %v543_v40  ;;  %672 = vst [vmem:[%s1141_s25 + $0x2d8] sm:$0xff] %v544_v41  ;;  %v312_v36 = vld [vmem:[%s1102_s11 + $0x3b8] sm:$0xff]  ;;  %v313_v41 = vld [vmem:[%s1102_s11 + $0x3c0] sm:$0xff] }
  0x7c   : > { %673 = vst [vmem:[%s1141_s25 + $0x2e0] sm:$0xff] %v545_v42  ;;  %v548_v51 = vadd.f32 %v1111_v2, %v418_v43  ;;  %v421_v52 = vmul.f32 %v1109_v1, %v291_v37  ;;  %v422_v53 = vmul.f32 %v1109_v1, %v292_v38  ;;  %v423_v54 = vmul.f32 %v1109_v1, %v293_v39  ;;  %v314_v42 = vld [vmem:[%s1102_s11 + $0x3c8] sm:$0xff] }
  0x7d   : > { %674 = vst [vmem:[%s1141_s25 + $0x2e8] sm:$0xff] %v546_v46  ;;  %675 = vst [vmem:[%s1141_s25 + $0x2f0] sm:$0xff] %v547_v47  ;;  %v549_v57 = vadd.f32 %v1111_v2, %v419_v48  ;;  %v550_v58 = vadd.f32 %v1111_v2, %v420_v49  ;;  %v424_v59 = vmul.f32 %v1109_v1, %v294_v44  ;;  %v315_v47 = vld [vmem:[%s1102_s11 + $0x3d0] sm:$0xff]  ;;  %v316_v48 = vld [vmem:[%s1102_s11 + $0x3d8] sm:$0xff] }
  0x7e   : > { %v425_v60 = vmul.f32 %v1109_v1, %v295_v45  ;;  %676 = vst [vmem:[%s1141_s25 + $0x2f8] sm:$0xff] %v548_v51  ;;  %v551_v0 = vadd.f32 %v1111_v2, %v421_v52  ;;  %v552_v3 = vadd.f32 %v1111_v2, %v422_v53  ;;  %v553_v4 = vadd.f32 %v1111_v2, %v423_v54  ;;  %v317_v49 = vld [vmem:[%s1102_s11 + $0x3e0] sm:$0xff]  ;;  %v318_v54 = vld [vmem:[%s1102_s11 + $0x3e8] sm:$0xff] }
  0x7f   : > { %v426_v5 = vmul.f32 %v1109_v1, %v296_v50  ;;  %677 = vst [vmem:[%s1141_s25 + $0x300] sm:$0xff] %v549_v57  ;;  %678 = vst [vmem:[%s1141_s25 + $0x308] sm:$0xff] %v550_v58  ;;  %v554_v8 = vadd.f32 %v1111_v2, %v424_v59  ;;  %v427_v10 = vmul.f32 %v1109_v1, %v297_v55  ;;  %v319_v55 = vld [vmem:[%s1102_s11 + $0x3f0] sm:$0xff] }
  0x80   : > { %v555_v9 = vadd.f32 %v1111_v2, %v425_v60  ;;  %v428_v11 = vmul.f32 %v1109_v1, %v298_v56  ;;  %679 = vst [vmem:[%s1141_s25 + $0x310] sm:$0xff] %v551_v0  ;;  %680 = vst [vmem:[%s1141_s25 + $0x318] sm:$0xff] %v552_v3  ;;  %v429_v14 = vmul.f32 %v1109_v1, %v299_v61  ;;  %v320_v60 = vld [vmem:[%s1102_s11 + $0x3f8] sm:$0xff] }
  0x81   : > { %681 = vst [vmem:[%s1141_s25 + $0x320] sm:$0xff] %v553_v4  ;;  %v556_v13 = vadd.f32 %v1111_v2, %v426_v5  ;;  %v430_v15 = vmul.f32 %v1109_v1, %v300_v62  ;;  %v431_v16 = vmul.f32 %v1109_v1, %v301_v63  ;;  %682 = vst [vmem:[%s1141_s25 + $0x328] sm:$0xff] %v554_v8 }
  0x82   : > { %683 = vst [vmem:[%s1141_s25 + $0x330] sm:$0xff] %v555_v9  ;;  %v557_v19 = vadd.f32 %v1111_v2, %v427_v10  ;;  %v558_v20 = vadd.f32 %v1111_v2, %v428_v11  ;;  %v432_v21 = vmul.f32 %v1109_v1, %v302_v6  ;;  %v433_v22 = vmul.f32 %v1109_v1, %v303_v7 }
  0x83   : > { %684 = vst [vmem:[%s1141_s25 + $0x338] sm:$0xff] %v556_v13  ;;  %v559_v26 = vadd.f32 %v1111_v2, %v429_v14  ;;  %v560_v27 = vadd.f32 %v1111_v2, %v430_v15  ;;  %v561_v28 = vadd.f32 %v1111_v2, %v431_v16  ;;  %v434_v29 = vmul.f32 %v1109_v1, %v304_v12 }
  0x84   : > { %685 = vst [vmem:[%s1141_s25 + $0x340] sm:$0xff] %v557_v19  ;;  %686 = vst [vmem:[%s1141_s25 + $0x348] sm:$0xff] %v558_v20  ;;  %v562_v32 = vadd.f32 %v1111_v2, %v432_v21  ;;  %v563_v33 = vadd.f32 %v1111_v2, %v433_v22  ;;  %v435_v34 = vmul.f32 %v1109_v1, %v305_v17 }
  0x85   : > { %v436_v35 = vmul.f32 %v1109_v1, %v306_v18  ;;  %687 = vst [vmem:[%s1141_s25 + $0x350] sm:$0xff] %v559_v26  ;;  %688 = vst [vmem:[%s1141_s25 + $0x358] sm:$0xff] %v560_v27  ;;  %v564_v37 = vadd.f32 %v1111_v2, %v434_v29  ;;  %v437_v38 = vmul.f32 %v1109_v1, %v307_v23 }
  0x86   : > { %689 = vst [vmem:[%s1141_s25 + $0x360] sm:$0xff] %v561_v28  ;;  %v438_v39 = vmul.f32 %v1109_v1, %v308_v24  ;;  %v439_v40 = vmul.f32 %v1109_v1, %v309_v25  ;;  %690 = vst [vmem:[%s1141_s25 + $0x368] sm:$0xff] %v562_v32  ;;  %v565_v43 = vadd.f32 %v1111_v2, %v435_v34 }
  0x87   : > { %691 = vst [vmem:[%s1141_s25 + $0x370] sm:$0xff] %v563_v33  ;;  %v566_v44 = vadd.f32 %v1111_v2, %v436_v35  ;;  %v440_v45 = vmul.f32 %v1109_v1, %v310_v30  ;;  %v441_v46 = vmul.f32 %v1109_v1, %v311_v31  ;;  %692 = vst [vmem:[%s1141_s25 + $0x378] sm:$0xff] %v564_v37 }
  0x88   : > { %v567_v50 = vadd.f32 %v1111_v2, %v437_v38  ;;  %v568_v51 = vadd.f32 %v1111_v2, %v438_v39  ;;  %v569_v52 = vadd.f32 %v1111_v2, %v439_v40  ;;  %v442_v53 = vmul.f32 %v1109_v1, %v312_v36  ;;  %693 = vst [vmem:[%s1141_s25 + $0x380] sm:$0xff] %v565_v43 }
  0x89   : > { %694 = vst [vmem:[%s1141_s25 + $0x388] sm:$0xff] %v566_v44  ;;  %v570_v56 = vadd.f32 %v1111_v2, %v440_v45  ;;  %v571_v57 = vadd.f32 %v1111_v2, %v441_v46  ;;  %v443_v58 = vmul.f32 %v1109_v1, %v313_v41  ;;  %v444_v59 = vmul.f32 %v1109_v1, %v314_v42 }
  0x8a   : > { %695 = vst [vmem:[%s1141_s25 + $0x390] sm:$0xff] %v567_v50  ;;  %696 = vst [vmem:[%s1141_s25 + $0x398] sm:$0xff] %v568_v51  ;;  %v572_v61 = vadd.f32 %v1111_v2, %v442_v53  ;;  %v445_v62 = vmul.f32 %v1109_v1, %v315_v47  ;;  %v446_v63 = vmul.f32 %v1109_v1, %v316_v48 }
  0x8b   : > { %697 = vst [vmem:[%s1141_s25 + $0x3a0] sm:$0xff] %v569_v52  ;;  %v447_v0 = vmul.f32 %v1109_v1, %v317_v49  ;;  %698 = vst [vmem:[%s1141_s25 + $0x3a8] sm:$0xff] %v570_v56  ;;  %v573_v3 = vadd.f32 %v1111_v2, %v443_v58  ;;  %v574_v4 = vadd.f32 %v1111_v2, %v444_v59 }
  0x8c   : > { %699 = vst [vmem:[%s1141_s25 + $0x3b0] sm:$0xff] %v571_v57  ;;  %v448_v5 = vmul.f32 %v1109_v1, %v318_v54  ;;  %v449_v6 = vmul.f32 %v1109_v1, %v319_v55  ;;  %700 = vst [vmem:[%s1141_s25 + $0x3b8] sm:$0xff] %v572_v61  ;;  %v575_v7 = vadd.f32 %v1111_v2, %v445_v62 }
  0x8d   : > { %v576_v8 = vadd.f32 %v1111_v2, %v446_v63  ;;  %v577_v9 = vadd.f32 %v1111_v2, %v447_v0  ;;  %v450_v10 = vmul.f32 %v1109_v1, %v320_v60  ;;  %701 = vst [vmem:[%s1141_s25 + $0x3c0] sm:$0xff] %v573_v3  ;;  %702 = vst [vmem:[%s1141_s25 + $0x3c8] sm:$0xff] %v574_v4 }
  0x8e   : > { %v578_v11 = vadd.f32 %v1111_v2, %v448_v5  ;;  %v579_v12 = vadd.f32 %v1111_v2, %v449_v6  ;;  %703 = vst [vmem:[%s1141_s25 + $0x3d0] sm:$0xff] %v575_v7 }
  0x8f   : > { %704 = vst [vmem:[%s1141_s25 + $0x3d8] sm:$0xff] %v576_v8  ;;  %705 = vst [vmem:[%s1141_s25 + $0x3e0] sm:$0xff] %v577_v9  ;;  %v580_v1 = vadd.f32 %v1111_v2, %v450_v10 }
  0x90   : > { %706 = vst [vmem:[%s1141_s25 + $0x3e8] sm:$0xff] %v578_v11  ;;  %707 = vst [vmem:[%s1141_s25 + $0x3f0] sm:$0xff] %v579_v12 }
  0x91   : > { %708 = vst [vmem:[%s1141_s25 + $0x3f8] sm:$0xff] %v580_v1 }
  0x92   : > { %905 = shalt.err (!%p902_p2)
}
  0x93   : > { %s906_s24 = scalar_lea.hbm %s1626_s13, 16384  ;;  %s910_s30 = scalar_lea.hbm %s1682_s3, 32768 }
  0x94   : > { %p907_p4 = scmp.ne.s32.totalorder %s1626_s13, %s906_s24  ;;  %p911_p9 = scmp.lt.u32.totalorder %s1626_s13, %s1682_s3 }
  0x95   : > { %p912_p1 = scmp.lt.u32.totalorder %s910_s30, %s906_s24  ;;  %p914_p6 = scmp.lt.u32.totalorder %s906_s24, %s1626_s13 }
  0x96   : > { %p908_p5 = pnand %p907_p4, %p1689_p11 }
  0x97   : > { %p913_p3 = por %p912_p1, %p911_p9 }
  0x98   : > { %p909_p7 = pneg %p908_p5 }
  0x99   : > { %p915_p12 = por %p914_p6, %p913_p3 }
  0x9b   : > { %p916_p13 = pnand %p915_p12, %p909_p7 }
  0x9d   : > { %919 = shalt.err (!%p916_p13)
}
  0x9e   : > { %s964_s11 = smov 128   ;;  %s965_s6 = smov 8  }
  0x9f   : > { %814 = dma.vmem_to_hbm [thread:$0]  (%p1689_p11), %s1628_s10, 16384, %s1626_s13, %s710_s14, %s964_s11, %s964_s11, %s965_s6  }
  0xa0 PF: > { %s738_s8 = sand.u32 1, %s946_s16   ;;  %p1690_p8 = scmp.ne.s32.totalorder %s1687_s27, 0 }
  0xa1   : > { %p1691_p10 = scmp.ge.s32.totalorder %s958_s19, 2  ;;  %s739_s25 = scalar_lea.sflag [#allocation6], %s738_s8 }
  0xa3   : > { %p821_p0 = pnand %p1691_p10, %p1690_p8 }
  0xa5   : > { %941 = dma.done.wait (!%p821_p0), %s739_s25, 16384  }
  0xa6   : > { %943 = vsyncadd (!%p821_p0), %s739_s25, 4294950912  ;;  %p18_p2 = scmp.ge.s32.totalorder %s1017_s20, 4   ;;  %s1692_s16 = smov %s950_s17 }
  0xa7   : > { %s1693_s17 = smov %s954_s18  ;;  %s1694_s18 = smov %s1029_s23 }
  0xa8   : > { %s1695_s19 = smov %s1017_s20  ;;  %20 = sbr.rel (!%p18_p2) target bundleno = 8 (0x8), region = 77 }
  0xaf   :  { %744 = vsyncpa [#allocation5], 1 }
  0xb0   :  { %746 = vsyncpa [#allocation5 + $0x1], 1 }
  0xb1   :  { %747 = vsyncpa [#allocation6], 1 }
  0xb2   :  { %749 = vsyncpa [#allocation6 + $0x1], 1 }

</bundles_post_ra>
